<compile_context>
chip_gen: v7x
topology: tpu7x:2x2x1
jax: 0.10.0
libtpu: 0.0.40
codegen_flags: <defaults>
</compile_context>

<pallas_src>
import math

import jax
import jax.numpy as jnp
from jax.experimental import pallas as pl
from jax.experimental.pallas import tpu as pltpu

HALF_LOG_2PI = 0.5 * math.log(2.0 * math.pi)


def _round_up(x: int, m: int) -> int:
    return (x + m - 1) // m * m


def bayesian_layer_kernel(x_ref, wmu_ref, wrho_ref, bmu_ref, brho_ref,
                          y_ref, logp_ref, acc_ref, lp_ref):
    i = pl.program_id(0)           # batch tile
    k = pl.program_id(2)           # reduction (in_features) tile
    nk = pl.num_programs(2)

    # Deterministic posterior "point" weights for this (out, in) tile.
    w = wmu_ref[...] + jax.nn.softplus(wrho_ref[...])             # (tn, tk)

    @pl.when(k == 0)
    def _init():
        acc_ref[...] = jnp.zeros_like(acc_ref)
        lp_ref[...] = jnp.zeros_like(lp_ref)

    # y_tile += x_tile @ W_tile^T without materializing a transpose:
    # contract the in_features (last) axis of both operands on the MXU.
    acc_ref[...] += jax.lax.dot_general(
        x_ref[...], w,
        dimension_numbers=(((1,), (1,)), ((), ())),
        preferred_element_type=jnp.float32)

    # log-prior quadratic term, counted once (first batch tile only); the
    # -n/2*log(2*pi) constant is added host-side with the unpadded count.
    @pl.when(i == 0)
    def _logp_w():
        lp_ref[...] += -0.5 * jnp.sum(w * w, keepdims=True)

    @pl.when(k == nk - 1)
    def _finalize():
        b = bmu_ref[...] + jax.nn.softplus(brho_ref[...])         # (1, tn)
        y_ref[...] = (acc_ref[...] + b).astype(y_ref.dtype)

        @pl.when(i == 0)
        def _logp_b():
            lp_ref[...] += -0.5 * jnp.sum(b * b, keepdims=True)

        # One lane-dense output tile per (i, j) block; the scalar partial is
        # broadcast across the tile and picked up host-side with a [::8,::128]
        # strided slice.  Blocks with i > 0 contribute exactly 0.
        logp_ref[...] = jnp.broadcast_to(lp_ref[...], logp_ref.shape)


def bayesian_layer_forward(x, w_mu, w_rho, b_mu, b_rho, *, tm=None, tn=None, tk=None):
    """x: (batch, in_features) f32; weights (out, in) like nn.Linear.

    Returns (y, log_prior, log_variational_posterior).
    """
    batch, in_features = x.shape
    out_features = w_mu.shape[0]

    # Tile sizes: lane-dense multiples of 128 (last dims), sublane multiple of
    # 8 for the batch dim; capped so double-buffered mu+rho tiles stay well
    # under v7x's 64 MiB physical VMEM (~6 MiB worst case here).
    if tm is None:
        tm = min(128, _round_up(batch, 8))
    if tn is None:
        tn = min(512, _round_up(out_features, 128))
    if tk is None:
        tk = min(512, _round_up(in_features, 128))

    B = _round_up(batch, tm)
    N = _round_up(out_features, tn)
    K = _round_up(in_features, tk)

    # Lane-dense padding (pure layout plumbing). rho is padded with -1e4 so
    # padded weights become mu(=0) + softplus(-1e4) = 0 exactly and contribute
    # nothing to the log-prior sum of squares or to the matmul.
    f32 = jnp.float32
    x_p = jnp.pad(x.astype(f32), ((0, B - batch), (0, K - in_features)))
    wmu_p = jnp.pad(w_mu.astype(f32),
                    ((0, N - out_features), (0, K - in_features)))
    wrho_p = jnp.pad(w_rho.astype(f32),
                     ((0, N - out_features), (0, K - in_features)),
                     constant_values=-1e4)
    bmu_p = jnp.pad(b_mu.astype(f32), (0, N - out_features)).reshape(1, N)
    brho_p = jnp.pad(b_rho.astype(f32), (0, N - out_features),
                     constant_values=-1e4).reshape(1, N)

    grid = (B // tm, N // tn, K // tk)

    y_p, logp_parts = pl.pallas_call(
        bayesian_layer_kernel,
        out_shape=(
            jax.ShapeDtypeStruct((B, N), f32),
            jax.ShapeDtypeStruct((grid[0] * 8, grid[1] * 128), f32),
        ),
        grid_spec=pltpu.PrefetchScalarGridSpec(
            num_scalar_prefetch=0,
            grid=grid,
            in_specs=[
                pl.BlockSpec((tm, tk), lambda i, j, k: (i, k)),   # x
                pl.BlockSpec((tn, tk), lambda i, j, k: (j, k)),   # w_mu
                pl.BlockSpec((tn, tk), lambda i, j, k: (j, k)),   # w_rho
                pl.BlockSpec((1, tn), lambda i, j, k: (0, j)),    # b_mu
                pl.BlockSpec((1, tn), lambda i, j, k: (0, j)),    # b_rho
            ],
            out_specs=(
                pl.BlockSpec((tm, tn), lambda i, j, k: (i, j)),   # y
                pl.BlockSpec((8, 128), lambda i, j, k: (i, j)),   # logp partials
            ),
            scratch_shapes=[
                pltpu.VMEM((tm, tn), f32),      # matmul accumulator
                pltpu.VMEM((1, 1), f32),        # per-block log-prior partial
            ],
        ),
        compiler_params=pltpu.CompilerParams(
            dimension_semantics=("parallel", "parallel", "arbitrary"),
            vmem_limit_bytes=32 * 1024 * 1024,
        ),
    )(x_p, wmu_p, wrho_p, bmu_p, brho_p)

    y = y_p[:batch, :out_features]

    # One scalar per (i, j) block (the tile is a broadcast of that scalar);
    # add the standard-normal log-density constant for the *real* (unpadded)
    # parameter count.
    n_params = out_features * in_features + out_features
    log_prior = jnp.sum(logp_parts[::8, ::128]) - n_params * HALF_LOG_2PI

    # MultivariateDiagonalGaussian.log_likelihood returns 0.0 in the reference
    # module, so the log-variational-posterior is a constant.
    log_var_posterior = jnp.float32(0.0)
    return y, log_prior, log_var_posterior


def _reference(x, w_mu, w_rho, b_mu, b_rho):
    w = w_mu + jax.nn.softplus(w_rho)
    b = b_mu + jax.nn.softplus(b_rho)
    y = x @ w.T + b
    lp = jnp.sum(-0.5 * w * w - HALF_LOG_2PI) + jnp.sum(-0.5 * b * b - HALF_LOG_2PI)
    return y, lp


def _make_params(key, batch, in_features, out_features):
    k_x, k_wmu, k_wrho, k_bmu, k_brho = jax.random.split(key, 5)
    x = jax.random.normal(k_x, (batch, in_features), jnp.float32)
    w_mu = 0.01 * jax.random.normal(k_wmu, (out_features, in_features), jnp.float32)
    w_rho = -2.5 + 0.01 * jax.random.normal(k_wrho, (out_features, in_features), jnp.float32)
    b_mu = 0.01 * jax.random.normal(k_bmu, (out_features,), jnp.float32)
    b_rho = -2.5 + 0.01 * jax.random.normal(k_brho, (out_features,), jnp.float32)
    return x, w_mu, w_rho, b_mu, b_rho


if __name__ == "__main__":
    key1, key2 = jax.random.split(jax.random.PRNGKey(0))

    # Case 1: tiny shapes matching the module's flattened-image convention
    # (single-tile grid).
    x, w_mu, w_rho, b_mu, b_rho = _make_params(key1, 8, 32, 16)
    y, log_prior, log_q = bayesian_layer_forward(x, w_mu, w_rho, b_mu, b_rho)
    jax.block_until_ready((y, log_prior, log_q))
    y_ref, lp_ref = _reference(x, w_mu, w_rho, b_mu, b_rho)
    assert y.shape == (8, 16)
    assert jnp.allclose(y, y_ref, atol=1e-4, rtol=1e-5)
    assert jnp.allclose(log_prior, lp_ref, atol=1e-2, rtol=1e-4)
    assert jnp.allclose(log_q, 0.0)

    # Case 2: non-aligned shapes with a real (2, 2, 3) grid to exercise the
    # tiled accumulation, padding, and per-block log-prior partial path.
    x, w_mu, w_rho, b_mu, b_rho = _make_params(key2, 16, 300, 200)
    y, log_prior, log_q = bayesian_layer_forward(x, w_mu, w_rho, b_mu, b_rho,
                                                 tm=8, tn=128, tk=128)
    jax.block_until_ready((y, log_prior, log_q))
    y_ref, lp_ref = _reference(x, w_mu, w_rho, b_mu, b_rho)
    assert y.shape == (16, 200)
    assert jnp.allclose(y, y_ref, atol=1e-4, rtol=1e-5)
    assert jnp.allclose(log_prior, lp_ref, atol=1e-1, rtol=1e-4)
    assert jnp.allclose(log_q, 0.0)

    print("KERNEL_OK")
</pallas_src>

<mosaic_0001>
module attributes {stable_mosaic.version = 11 : i64} {
  func.func @bayesian_layer_kernel(%arg0: i32, %arg1: i32, %arg2: i32, %arg3: memref<8x128xf32, #tpu.memory_space<vmem>>, %arg4: memref<128x128xf32, #tpu.memory_space<vmem>>, %arg5: memref<128x128xf32, #tpu.memory_space<vmem>>, %arg6: memref<1x128xf32, #tpu.memory_space<vmem>>, %arg7: memref<1x128xf32, #tpu.memory_space<vmem>>, %arg8: memref<8x128xf32, #tpu.memory_space<vmem>>, %arg9: memref<8x128xf32, #tpu.memory_space<vmem>>, %arg10: memref<8x128xf32, #tpu.memory_space<vmem>>, %arg11: memref<1x1xf32, #tpu.memory_space<vmem>>) attributes {dimension_semantics = [#tpu.dimension_semantics<parallel>, #tpu.dimension_semantics<parallel>, #tpu.dimension_semantics<arbitrary>], iteration_bounds = array<i64: 1, 1, 1>, scalar_prefetch = 0 : i64, scratch_operands = 2 : i64, tpu.core_type = #tpu.core_type<tc>, window_params = [{transform_indices = @transform_0, window_bounds = array<i64: 8, 128>}, {transform_indices = @transform_1, window_bounds = array<i64: 128, 128>}, {transform_indices = @transform_2, window_bounds = array<i64: 128, 128>}, {transform_indices = @transform_3, window_bounds = array<i64: 1, 128>}, {transform_indices = @transform_4, window_bounds = array<i64: 1, 128>}, {transform_indices = @transform_5, window_bounds = array<i64: 8, 128>}, {transform_indices = @transform_6, window_bounds = array<i64: 8, 128>}]} {
    %c0 = arith.constant 0 : index
    %c0_0 = arith.constant 0 : index
    %0 = vector.load %arg4[%c0, %c0_0] : memref<128x128xf32, #tpu.memory_space<vmem>>, vector<128x128xf32>
    %c0_1 = arith.constant 0 : index
    %c0_2 = arith.constant 0 : index
    %1 = vector.load %arg5[%c0_1, %c0_2] : memref<128x128xf32, #tpu.memory_space<vmem>>, vector<128x128xf32>
    %cst = arith.constant 0.000000e+00 : f32
    %2 = vector.broadcast %cst : f32 to vector<128x128xf32>
    %3 = arith.maximumf %1, %2 : vector<128x128xf32>
    %4 = vector.broadcast %cst : f32 to vector<128x128xf32>
    %5 = arith.subf %1, %4 : vector<128x128xf32>
    %6 = arith.cmpf one, %5, %5 : vector<128x128xf32>
    %7 = vector.broadcast %cst : f32 to vector<128x128xf32>
    %8 = arith.addf %1, %7 : vector<128x128xf32>
    %9 = math.absf %5 : vector<128x128xf32>
    %cst_3 = arith.constant 0.000000e+00 : f32
    %10 = vector.broadcast %cst_3 : f32 to vector<128x128xf32>
    %11 = arith.subf %10, %9 : vector<128x128xf32>
    %12 = math.exp %11 : vector<128x128xf32>
    %13 = math.log1p %12 : vector<128x128xf32>
    %14 = arith.addf %3, %13 : vector<128x128xf32>
    %15 = arith.select %6, %8, %14 : vector<128x128xi1>, vector<128x128xf32>
    %16 = arith.addf %0, %15 : vector<128x128xf32>
    %c0_i32 = arith.constant 0 : i32
    %17 = arith.cmpi eq, %arg2, %c0_i32 : i32
    %18 = arith.extui %17 : i1 to i32
    %c0_i32_4 = arith.constant 0 : i32
    %19 = arith.cmpi ne, %18, %c0_i32_4 : i32
    scf.if %19 {
      %cst_16 = arith.constant 0.000000e+00 : f32
      %31 = vector.broadcast %cst_16 : f32 to vector<8x128xf32>
      %c0_17 = arith.constant 0 : index
      %c0_18 = arith.constant 0 : index
      %32 = vector.load %arg10[%c0_17, %c0_18] : memref<8x128xf32, #tpu.memory_space<vmem>>, vector<8x128xf32>
      tpu.vector_store %arg10[%c0_17, %c0_18], %31 {strides = array<i32>} : memref<8x128xf32, #tpu.memory_space<vmem>>, vector<8x128xf32>,
      %cst_19 = arith.constant 0.000000e+00 : f32
      %33 = vector.broadcast %cst_19 : f32 to vector<1x1xf32>
      %c0_20 = arith.constant 0 : index
      %c0_21 = arith.constant 0 : index
      %34 = vector.load %arg11[%c0_20, %c0_21] : memref<1x1xf32, #tpu.memory_space<vmem>>, vector<1x1xf32>
      tpu.vector_store %arg11[%c0_20, %c0_21], %33 {strides = array<i32>} : memref<1x1xf32, #tpu.memory_space<vmem>>, vector<1x1xf32>,
    } else {
    }
    %c0_5 = arith.constant 0 : index
    %c0_6 = arith.constant 0 : index
    %20 = vector.load %arg10[%c0_5, %c0_6] : memref<8x128xf32, #tpu.memory_space<vmem>>, vector<8x128xf32>
    %c0_7 = arith.constant 0 : index
    %c0_8 = arith.constant 0 : index
    %21 = vector.load %arg3[%c0_7, %c0_8] : memref<8x128xf32, #tpu.memory_space<vmem>>, vector<8x128xf32>
    %cst_9 = arith.constant dense<0.000000e+00> : vector<8x128xf32>
    %22 = tpu.matmul %21, %16, %cst_9 {dimension_numbers = #tpu.dot_dimension_numbers<[1], [1], [0], [0], [0, 0, 1, 0], [], []>} : vector<8x128xf32>, vector<128x128xf32>, vector<8x128xf32> -> vector<8x128xf32>
    %23 = arith.addf %20, %22 : vector<8x128xf32>
    %c0_10 = arith.constant 0 : index
    %c0_11 = arith.constant 0 : index
    %24 = vector.load %arg10[%c0_10, %c0_11] : memref<8x128xf32, #tpu.memory_space<vmem>>, vector<8x128xf32>
    tpu.vector_store %arg10[%c0_10, %c0_11], %23 {strides = array<i32>} : memref<8x128xf32, #tpu.memory_space<vmem>>, vector<8x128xf32>,
    %c0_i32_12 = arith.constant 0 : i32
    %25 = arith.cmpi eq, %arg0, %c0_i32_12 : i32
    %26 = arith.extui %25 : i1 to i32
    %c0_i32_13 = arith.constant 0 : i32
    %27 = arith.cmpi ne, %26, %c0_i32_13 : i32
    scf.if %27 {
      %c0_16 = arith.constant 0 : index
      %c0_17 = arith.constant 0 : index
      %31 = vector.load %arg11[%c0_16, %c0_17] : memref<1x1xf32, #tpu.memory_space<vmem>>, vector<1x1xf32>
      %32 = arith.mulf %16, %16 : vector<128x128xf32>
      %33 = vector.shape_cast %32 : vector<128x128xf32> to vector<1x128x128xf32>
      %cst_18 = arith.constant dense<0.000000e+00> : vector<1xf32>
      %34 = vector.multi_reduction <add>, %33, %cst_18 [1, 2] : vector<1x128x128xf32> to vector<1xf32>
      %35 = vector.shape_cast %34 : vector<1xf32> to vector<1x1x1xf32>
      %36 = vector.extract %35[0, 0, 0] : f32 from vector<1x1x1xf32>
      %37 = vector.broadcast %36 : f32 to vector<1x1xf32>
      %cst_19 = arith.constant -5.000000e-01 : f32
      %38 = vector.broadcast %cst_19 : f32 to vector<1x1xf32>
      %39 = arith.mulf %38, %37 : vector<1x1xf32>
      %40 = arith.addf %31, %39 : vector<1x1xf32>
      %c0_20 = arith.constant 0 : index
      %c0_21 = arith.constant 0 : index
      %41 = vector.load %arg11[%c0_20, %c0_21] : memref<1x1xf32, #tpu.memory_space<vmem>>, vector<1x1xf32>
      tpu.vector_store %arg11[%c0_20, %c0_21], %40 {strides = array<i32>} : memref<1x1xf32, #tpu.memory_space<vmem>>, vector<1x1xf32>,
    } else {
    }
    %c0_i32_14 = arith.constant 0 : i32
    %28 = arith.cmpi eq, %arg2, %c0_i32_14 : i32
    %29 = arith.extui %28 : i1 to i32
    %c0_i32_15 = arith.constant 0 : i32
    %30 = arith.cmpi ne, %29, %c0_i32_15 : i32
    scf.if %30 {
      %c0_16 = arith.constant 0 : index
      %c0_17 = arith.constant 0 : index
      %31 = vector.load %arg6[%c0_16, %c0_17] : memref<1x128xf32, #tpu.memory_space<vmem>>, vector<1x128xf32>
      %c0_18 = arith.constant 0 : index
      %c0_19 = arith.constant 0 : index
      %32 = vector.load %arg7[%c0_18, %c0_19] : memref<1x128xf32, #tpu.memory_space<vmem>>, vector<1x128xf32>
      %cst_20 = arith.constant 0.000000e+00 : f32
      %33 = vector.broadcast %cst_20 : f32 to vector<1x128xf32>
      %34 = arith.maximumf %32, %33 : vector<1x128xf32>
      %35 = vector.broadcast %cst_20 : f32 to vector<1x128xf32>
      %36 = arith.subf %32, %35 : vector<1x128xf32>
      %37 = arith.cmpf one, %36, %36 : vector<1x128xf32>
      %38 = vector.broadcast %cst_20 : f32 to vector<1x128xf32>
      %39 = arith.addf %32, %38 : vector<1x128xf32>
      %40 = math.absf %36 : vector<1x128xf32>
      %cst_21 = arith.constant 0.000000e+00 : f32
      %41 = vector.broadcast %cst_21 : f32 to vector<1x128xf32>
      %42 = arith.subf %41, %40 : vector<1x128xf32>
      %43 = math.exp %42 : vector<1x128xf32>
      %44 = math.log1p %43 : vector<1x128xf32>
      %45 = arith.addf %34, %44 : vector<1x128xf32>
      %46 = arith.select %37, %39, %45 : vector<1x128xi1>, vector<1x128xf32>
      %47 = arith.addf %31, %46 : vector<1x128xf32>
      %c0_22 = arith.constant 0 : index
      %c0_23 = arith.constant 0 : index
      %48 = vector.load %arg10[%c0_22, %c0_23] : memref<8x128xf32, #tpu.memory_space<vmem>>, vector<8x128xf32>
      %49 = vector.broadcast %47 : vector<1x128xf32> to vector<8x128xf32>
      %50 = arith.addf %48, %49 : vector<8x128xf32>
      %c0_24 = arith.constant 0 : index
      %c0_25 = arith.constant 0 : index
      %51 = vector.load %arg8[%c0_24, %c0_25] : memref<8x128xf32, #tpu.memory_space<vmem>>, vector<8x128xf32>
      tpu.vector_store %arg8[%c0_24, %c0_25], %50 {strides = array<i32>} : memref<8x128xf32, #tpu.memory_space<vmem>>, vector<8x128xf32>,
      %c0_i32_26 = arith.constant 0 : i32
      %52 = arith.cmpi eq, %arg0, %c0_i32_26 : i32
      %53 = arith.extui %52 : i1 to i32
      %c0_i32_27 = arith.constant 0 : i32
      %54 = arith.cmpi ne, %53, %c0_i32_27 : i32
      scf.if %54 {
        %c0_32 = arith.constant 0 : index
        %c0_33 = arith.constant 0 : index
        %59 = vector.load %arg11[%c0_32, %c0_33] : memref<1x1xf32, #tpu.memory_space<vmem>>, vector<1x1xf32>
        %60 = arith.mulf %47, %47 : vector<1x128xf32>
        %61 = vector.shape_cast %60 : vector<1x128xf32> to vector<1x1x128xf32>
        %cst_34 = arith.constant dense<0.000000e+00> : vector<1xf32>
        %62 = vector.multi_reduction <add>, %61, %cst_34 [1, 2] : vector<1x1x128xf32> to vector<1xf32>
        %63 = vector.shape_cast %62 : vector<1xf32> to vector<1x1x1xf32>
        %64 = vector.extract %63[0, 0, 0] : f32 from vector<1x1x1xf32>
        %65 = vector.broadcast %64 : f32 to vector<1x1xf32>
        %cst_35 = arith.constant -5.000000e-01 : f32
        %66 = vector.broadcast %cst_35 : f32 to vector<1x1xf32>
        %67 = arith.mulf %66, %65 : vector<1x1xf32>
        %68 = arith.addf %59, %67 : vector<1x1xf32>
        %c0_36 = arith.constant 0 : index
        %c0_37 = arith.constant 0 : index
        %69 = vector.load %arg11[%c0_36, %c0_37] : memref<1x1xf32, #tpu.memory_space<vmem>>, vector<1x1xf32>
        tpu.vector_store %arg11[%c0_36, %c0_37], %68 {strides = array<i32>} : memref<1x1xf32, #tpu.memory_space<vmem>>, vector<1x1xf32>,
      } else {
      }
      %c0_28 = arith.constant 0 : index
      %c0_29 = arith.constant 0 : index
      %55 = vector.load %arg11[%c0_28, %c0_29] : memref<1x1xf32, #tpu.memory_space<vmem>>, vector<1x1xf32>
      %56 = vector.shape_cast %55 : vector<1x1xf32> to vector<1x1xf32>
      %57 = vector.broadcast %56 : vector<1x1xf32> to vector<8x128xf32>
      %c0_30 = arith.constant 0 : index
      %c0_31 = arith.constant 0 : index
      %58 = vector.load %arg9[%c0_30, %c0_31] : memref<8x128xf32, #tpu.memory_space<vmem>>, vector<8x128xf32>
      tpu.vector_store %arg9[%c0_30, %c0_31], %57 {strides = array<i32>} : memref<8x128xf32, #tpu.memory_space<vmem>>, vector<8x128xf32>,
    } else {
    }
    return
  }
  func.func @transform_0(%arg0: i32, %arg1: i32, %arg2: i32) -> (i32, i32) {
    %c0_i32 = arith.constant 0 : i32
    return %arg0, %arg2 : i32, i32
  }
  func.func @transform_1(%arg0: i32, %arg1: i32, %arg2: i32) -> (i32, i32) {
    %c0_i32 = arith.constant 0 : i32
    return %arg1, %arg2 : i32, i32
  }
  func.func @transform_2(%arg0: i32, %arg1: i32, %arg2: i32) -> (i32, i32) {
    %c0_i32 = arith.constant 0 : i32
    return %arg1, %arg2 : i32, i32
  }
  func.func @transform_3(%arg0: i32, %arg1: i32, %arg2: i32) -> (i32, i32) {
    %c0_i32 = arith.constant 0 : i32
    %c0_i32_0 = arith.constant 0 : i32
    return %c0_i32, %arg1 : i32, i32
  }
  func.func @transform_4(%arg0: i32, %arg1: i32, %arg2: i32) -> (i32, i32) {
    %c0_i32 = arith.constant 0 : i32
    %c0_i32_0 = arith.constant 0 : i32
    return %c0_i32, %arg1 : i32, i32
  }
  func.func @transform_5(%arg0: i32, %arg1: i32, %arg2: i32) -> (i32, i32) {
    %c0_i32 = arith.constant 0 : i32
    return %arg0, %arg1 : i32, i32
  }
  func.func @transform_6(%arg0: i32, %arg1: i32, %arg2: i32) -> (i32, i32) {
    %c0_i32 = arith.constant 0 : i32
    return %arg0, %arg1 : i32, i32
  }
}

</mosaic_0001>

<bundles_post_ra>
// kernel: tpu_custom_call.1
= control target key start
LH: loop header
LB: loop body
LE: loop exit
PB: predicated region body
PF: predicated region fallthrough
CT: control target
= control target key end

     0   :  { %12 = vsyncpa [#allocation5], 0  ;;  %s1529_s0 = inlined_call_operand.hbm [shape: f32[8,128], index: 0, kind: input, shape index: {}]   ;;  %s1530_s1 = inlined_call_operand.hbm [shape: f32[128,128], index: 1, kind: input, shape index: {}]   ;;  %s1531_s2 = inlined_call_operand.hbm [shape: f32[128,128], index: 2, kind: input, shape index: {}]   ;;  %s1532_s3 = inlined_call_operand.vmem [shape: f32[1,128], index: 3, kind: input, shape index: {}]   ;;  %s1533_s4 = inlined_call_operand.vmem [shape: f32[1,128], index: 4, kind: input, shape index: {}]   ;;  %s1534_s5 = inlined_call_operand.hbm [shape: f32[8,128], index: 5, kind: output, shape index: {0}]   ;;  %s1535_s6 = inlined_call_operand.hbm [shape: f32[8,128], index: 6, kind: output, shape index: {1}]  }
   0x1   :  { %13 = vsyncpa [#allocation8], 0 }
   0x2   :  { %14 = vsyncpa [#allocation6], 0 }
   0x3   :  { %15 = vsyncpa [#allocation12], 0  ;;  %s905_s21 = smov [#allocation7]   ;;  %s787_s25 = scalar_lea.hbm %s1530_s1, 2048 }
   0x4   :  { %s31_s22 = sshll.u32 %s905_s21, 4  ;;  %p788_p0 = scmp.ne.s32.totalorder %s1530_s1, %s787_s25  ;;  %s32_s22 = int_to_ptr.vmem [resolvable:$true] %s31_s22 }
   0x5   :  { %p791_p1 = scmp.lt.u32.totalorder %s787_s25, %s1530_s1 }
   0x7   :  { %p793_p2 = pnand %p791_p1, %p788_p0 }
   0x9   :  { %796 = shalt.err (!%p793_p2)
}
   0xa   :  { %s797_s30 = scalar_lea.vmem %s32_s22, 2048  ;;  %p802_p4 = scmp.lt.s32.totalorder %s32_s22, %s32_s22 }
   0xb   :  { %p798_p3 = scmp.ne.s32.totalorder %s32_s22, %s797_s30  ;;  %p803_p5 = scmp.lt.s32.totalorder %s797_s30, %s797_s30 }
   0xd   :  { %p804_p6 = por %p803_p5, %p802_p4 }
   0xf   :  { %p805_p7 = pnand %p804_p6, %p798_p3 }
  0x11   :  { %808 = shalt.err (!%p805_p7)
}
  0x12   :  { %s906_s7 = smov 128   ;;  %s907_s8 = smov 8  }
  0x13   :  { %37 = dma.hbm_to_vmem [thread:$0]  %s1530_s1, 2048, %s32_s22, [#allocation8], %s906_s7, %s906_s7, %s907_s8  }
  0x14   :  { %s908_s11 = smov [#allocation4]   ;;  %s909_s13 = smov [#allocation9]  }
  0x15   :  { %s22_s12 = sshll.u32 %s908_s11, 4  ;;  %s43_s14 = sshll.u32 %s909_s13, 4  ;;  %s23_s12 = int_to_ptr.vmem [resolvable:$true] %s22_s12  ;;  %s44_s14 = int_to_ptr.vmem [resolvable:$true] %s43_s14 }
  0x16   :  { %s809_s17 = scalar_lea.hbm %s1529_s0, 128 }
  0x17   :  { %p810_p8 = scmp.ne.s32.totalorder %s1529_s0, %s809_s17  ;;  %p813_p9 = scmp.lt.u32.totalorder %s809_s17, %s1529_s0 }
  0x19   :  { %p815_p10 = pnand %p813_p9, %p810_p8 }
  0x1b   :  { %818 = shalt.err (!%p815_p10)
}
  0x1c   :  { %s819_s1 = scalar_lea.vmem %s23_s12, 128  ;;  %p824_p12 = scmp.lt.s32.totalorder %s23_s12, %s23_s12 }
  0x1d   :  { %p820_p11 = scmp.ne.s32.totalorder %s23_s12, %s819_s1  ;;  %p825_p13 = scmp.lt.s32.totalorder %s819_s1, %s819_s1 }
  0x1f   :  { %p826_p0 = por %p825_p13, %p824_p12 }
  0x21   :  { %p827_p1 = pnand %p826_p0, %p820_p11 }
  0x23   :  { %830 = shalt.err (!%p827_p1)
}
  0x24   :  { %25 = dma.hbm_to_vmem [thread:$0]  %s1529_s0, 128, %s23_s12, [#allocation5]  }
  0x25   :  { %s831_s26 = scalar_lea.hbm %s1531_s2, 2048 }
  0x26   :  { %p832_p2 = scmp.ne.s32.totalorder %s1531_s2, %s831_s26  ;;  %p835_p3 = scmp.lt.u32.totalorder %s831_s26, %s1531_s2 }
  0x28   :  { %p837_p4 = pnand %p835_p3, %p832_p2 }
  0x2a   :  { %840 = shalt.err (!%p837_p4)
}
  0x2b   :  { %s841_s9 = scalar_lea.vmem %s44_s14, 2048  ;;  %p846_p6 = scmp.lt.s32.totalorder %s44_s14, %s44_s14 }
  0x2c   :  { %p842_p5 = scmp.ne.s32.totalorder %s44_s14, %s841_s9  ;;  %p847_p7 = scmp.lt.s32.totalorder %s841_s9, %s841_s9 }
  0x2e   :  { %p848_p8 = por %p847_p7, %p846_p6 }
  0x30   :  { %p849_p9 = pnand %p848_p8, %p842_p5 }
  0x32   :  { %852 = shalt.err (!%p849_p9)
}
  0x33   :  { %49 = dma.hbm_to_vmem [thread:$0]  %s1531_s2, 2048, %s44_s14, [#allocation8], %s906_s7, %s906_s7, %s907_s8  }
  0x34   :  { %897 = dma.done.wait [#allocation5], 128  }
  0x35   :  { %898 = vsyncadd [#allocation5], 4294967168 }
  0x36   :  { %899 = dma.done.wait [#allocation8], 4096  }
  0x37   :  { %900 = vsyncadd [#allocation8], 4294963200  ;;  %v1536_v0 = vmov 0.0|0.0   ;;  %v994_v1 = vld [vmem:[#allocation9] sm:$0xff]  ;;  %v996_v2 = vld [vmem:[#allocation9 + $0x8] sm:$0xff]  ;;  %vm404_vm0 = vcmask 0  }
  0x38   :  { %678 = vmatprep.subr.bf16.mxu0 %v1536_v0  ;;  %v998_v3 = vld [vmem:[#allocation9 + $0x10] sm:$0xff]  ;;  %v1000_v4 = vld [vmem:[#allocation9 + $0x18] sm:$0xff]  ;;  %v1002_v5 = vld [vmem:[#allocation9 + $0x20] sm:$0xff]  ;;  %v143_v6 = vand.u32 2147483647, %v994_v1  ;;  %v911_v28 = vmov 0.0   ;;  %vm111_vm9 = vcmp.ne.f32.partialorder %v994_v1, %v994_v1  ;;  %vm112_vm10 = vcmp.ne.f32.partialorder %v996_v2, %v996_v2 }
  0x39   :  { %v144_v7 = vand.u32 2147483647, %v996_v2  ;;  %v1006_v8 = vld [vmem:[#allocation9 + $0x28] sm:$0xff]  ;;  %v145_v9 = vand.u32 2147483647, %v998_v3  ;;  %v1011_v12 = vld [vmem:[#allocation9 + $0x30] sm:$0xff]  ;;  %vm113_vm13 = vcmp.ne.f32.partialorder %v998_v3, %v998_v3  ;;  %vm114_vm15 = vcmp.ne.f32.partialorder %v1000_v4, %v1000_v4 }
  0x3a   :  { %v146_v10 = vand.u32 2147483647, %v1000_v4  ;;  %v147_v11 = vand.u32 2147483647, %v1002_v5  ;;  %v159_v13 = vsub.f32 0.0, %v143_v6  ;;  %v1014_v16 = vld [vmem:[#allocation9 + $0x38] sm:$0xff] }
  0x3b   :  { %v148_v14 = vand.u32 2147483647, %v1006_v8  ;;  %v160_v15 = vsub.f32 0.0, %v144_v7  ;;  %v161_v17 = vsub.f32 0.0, %v145_v9  ;;  %v1016_v18 = vld [vmem:[#allocation9 + $0x40] sm:$0xff]  ;;  %v1019_v22 = vld [vmem:[#allocation9 + $0x48] sm:$0xff] }
  0x3c   :  { %v149_v19 = vand.u32 2147483647, %v1011_v12  ;;  %v162_v20 = vsub.f32 0.0, %v146_v10  ;;  %v163_v21 = vsub.f32 0.0, %v147_v11  ;;  %v175_v23 = vmul.f32 1.442695, %v159_v13 }
  0x3d   :  { %v1021_v24 = vld [vmem:[#allocation9 + $0x50] sm:$0xff]  ;;  %v150_v25 = vand.u32 2147483647, %v1014_v16  ;;  %v164_v26 = vsub.f32 0.0, %v148_v14  ;;  %v177_v27 = vmul.f32 1.442695, %v160_v15 }
  0x3e   :  { %405 = vst.msk [vmem:[#allocation3] sm:$0x1] %vm404_vm0, %v911_v28  ;;  %vm912_vm1 = vmmov 0   ;;  %v1025_v29 = vld [vmem:[#allocation9 + $0x58] sm:$0xff]  ;;  %v151_v30 = vand.u32 2147483647, %v1016_v18  ;;  %719 = vpow2.f32 %v175_v23 }
  0x3f   :  { %675 = vmatprep.mubr.msk.f32.mxu0 %vm912_vm1, %v911_v28  ;;  %v179_v31 = vmul.f32 1.442695, %v161_v17  ;;  %v1028_v32 = vld [vmem:[#allocation9 + $0x60] sm:$0xff]  ;;  %v152_v33 = vand.u32 2147483647, %v1019_v22  ;;  %v1031_v35 = vld [vmem:[#allocation9 + $0x68] sm:$0xff]  ;;  %721 = vpow2.f32 %v177_v27  ;;  %vm115_vm1 = vcmp.ne.f32.partialorder %v1002_v5, %v1002_v5 }
  0x40   :  { %v181_v34 = vmul.f32 1.442695, %v162_v20  ;;  %v153_v36 = vand.u32 2147483647, %v1021_v24  ;;  %v165_v37 = vsub.f32 0.0, %v149_v19  ;;  %v1034_v39 = vld [vmem:[#allocation9 + $0x70] sm:$0xff] }
  0x41   :  { %v183_v38 = vmul.f32 1.442695, %v163_v21  ;;  %v154_v40 = vand.u32 2147483647, %v1025_v29  ;;  %v166_v41 = vsub.f32 0.0, %v150_v25  ;;  %v167_v44 = vsub.f32 0.0, %v151_v30 }
  0x42   :  { %v185_v42 = vmul.f32 1.442695, %v164_v26  ;;  %v155_v43 = vand.u32 2147483647, %v1028_v32  ;;  %723 = vpow2.f32 %v179_v31  ;;  %v156_v45 = vand.u32 2147483647, %v1031_v35 }
  0x43   :  { %v168_v46 = vsub.f32 0.0, %v152_v33  ;;  %725 = vpow2.f32 %v181_v34  ;;  %v157_v47 = vand.u32 2147483647, %v1034_v39  ;;  %v169_v48 = vsub.f32 0.0, %v153_v36  ;;  %v1040_v56 = vld [vmem:[#allocation9 + $0x78] sm:$0xff]  ;;  %s914_s12 = smov [#allocation10]  }
  0x44   :  { %727 = vpow2.f32 %v183_v38  ;;  %v187_v49 = vmul.f32 1.442695, %v165_v37  ;;  %v170_v50 = vsub.f32 0.0, %v154_v40  ;;  %v189_v51 = vmul.f32 1.442695, %v166_v41  ;;  %s601_s13 = sshll.u32 %s914_s12, 4  ;;  %s602_s13 = int_to_ptr.vmem [resolvable:$true] %s601_s13 }
  0x45   :  { %729 = vpow2.f32 %v185_v42  ;;  %v171_v52 = vsub.f32 0.0, %v155_v43  ;;  %v191_v53 = vmul.f32 1.442695, %v167_v44  ;;  %v172_v54 = vsub.f32 0.0, %v156_v45  ;;  %v1049_v6 = vld [vmem:[%s1533_s4] sm:$0x1]  ;;  %p858_p11 = scmp.lt.s32.totalorder %s602_s13, %s602_s13 }
  0x46   :  { %v193_v55 = vmul.f32 1.442695, %v168_v46  ;;  %v173_v57 = vsub.f32 0.0, %v157_v47  ;;  %731 = vpow2.f32 %v187_v49  ;;  %v195_v58 = vmul.f32 1.442695, %v169_v48  ;;  %s853_s14 = scalar_lea.vmem %s602_s13, 128 }
  0x47   :  { %733 = vpow2.f32 %v189_v51  ;;  %v197_v59 = vmul.f32 1.442695, %v170_v50  ;;  %v95_v61 = vmax.f32 %v994_v1, 0.0  ;;  %v199_v63 = vmul.f32 1.442695, %v171_v52  ;;  %p854_p10 = scmp.ne.s32.totalorder %s602_s13, %s853_s14  ;;  %p859_p12 = scmp.lt.s32.totalorder %s853_s14, %s853_s14 }
  0x48   :  { %v1042_v60 = vpop.eup %719  ;;  %735 = vpow2.f32 %v191_v53  ;;  %v158_v10 = vand.u32 2147483647, %v1040_v56  ;;  %v201_v11 = vmul.f32 1.442695, %v172_v54  ;;  %v203_v17 = vmul.f32 1.442695, %v173_v57 }
  0x49   :  { %v1051_v7 = vpop.eup %721  ;;  %737 = vpow2.f32 %v193_v55  ;;  %v207_v21 = vadd.f32 1.0, %v1042_v60  ;;  %v538_v23 = vand.u32 2147483647, %v1049_v6  ;;  %v210_v36 = vmul.f32 -0.5, %v1042_v60  ;;  %p860_p13 = por %p859_p12, %p858_p11 }
  0x4a   :  { %739 = vpow2.f32 %v195_v58  ;;  %v216_v28 = vadd.f32 1.0, %v1051_v7  ;;  %v174_v33 = vsub.f32 0.0, %v158_v10  ;;  %v219_v37 = vmul.f32 -0.5, %v1051_v7 }
  0x4b   :  { %741 = vpow2.f32 %v197_v59  ;;  %v539_v42 = vsub.f32 0.0, %v538_v23  ;;  %v211_v52 = vadd.f32 1.0, %v210_v36  ;;  %v213_v57 = vand.u32 2147483647, %v1042_v60  ;;  %p861_p0 = pnand %p860_p13, %p854_p10 }
  0x4c   :  { %v1055_v13 = vpop.eup %723  ;;  %743 = vpow2.f32 %v199_v63  ;;  %v205_v50 = vmul.f32 1.442695, %v174_v33  ;;  %v220_v53 = vadd.f32 1.0, %v219_v37  ;;  %v222_v10 = vand.u32 2147483647, %v1051_v7 }
  0x4d   :  { %v1059_v19 = vpop.eup %725  ;;  %745 = vpow2.f32 %v201_v11  ;;  %v225_v34 = vadd.f32 1.0, %v1055_v13  ;;  %v228_v54 = vmul.f32 -0.5, %v1055_v13  ;;  %v1094_v59 = vmul.f32 1.442695, %v539_v42 }
  0x4e   :  { %v1064_v25 = vpop.eup %727  ;;  %747 = vpow2.f32 %v203_v17  ;;  %v234_v38 = vadd.f32 1.0, %v1059_v19  ;;  %v237_v58 = vmul.f32 -0.5, %v1059_v19  ;;  %v231_v23 = vand.u32 2147483647, %v1055_v13 }
  0x4f   :  { %v1069_v30 = vpop.eup %729  ;;  %749 = vlog2.f32 %v207_v21  ;;  %v243_v41 = vadd.f32 1.0, %v1064_v25  ;;  %v246_v11 = vmul.f32 -0.5, %v1064_v25  ;;  %v1109_v36 = vmul.f32 %v1042_v60, %v211_v52 }
  0x50   :  { %v1078_v43 = vpop.eup %731  ;;  %751 = vlog2.f32 %v216_v28  ;;  %v252_v46 = vadd.f32 1.0, %v1069_v30  ;;  %v255_v28 = vmul.f32 -0.5, %v1069_v30  ;;  %v1112_v37 = vmul.f32 %v1051_v7, %v220_v53 }
  0x51   :  { %v1083_v47 = vpop.eup %733  ;;  %753 = vlog2.f32 %v225_v34  ;;  %v261_v17 = vadd.f32 1.0, %v1078_v43  ;;  %vm1117_vm2 = vcmp.lt.f32.partialorder %v213_v57, 0.0004427343  ;;  %v240_v49 = vand.u32 2147483647, %v1059_v19 }
  0x52   :  { %v1087_v51 = vpop.eup %735  ;;  %755 = vlog2.f32 %v234_v38  ;;  %v270_v33 = vadd.f32 1.0, %v1083_v47  ;;  %v229_v38 = vadd.f32 1.0, %v228_v54  ;;  %v264_v48 = vmul.f32 -0.5, %v1078_v43 }
  0x53   :  { %v1090_v55 = vpop.eup %737  ;;  %757 = vlog2.f32 %v243_v41  ;;  %v279_v41 = vadd.f32 1.0, %v1087_v51  ;;  %vm1126_vm3 = vcmp.lt.f32.partialorder %v222_v10, 0.0004427343  ;;  %v247_v53 = vadd.f32 1.0, %v246_v11 }
  0x54   :  { %v1096_v63 = vpop.eup %739  ;;  %759 = vlog2.f32 %v252_v46  ;;  %v288_v60 = vadd.f32 1.0, %v1090_v55  ;;  %v249_v54 = vand.u32 2147483647, %v1064_v25  ;;  %v258_v57 = vand.u32 2147483647, %v1069_v30 }
  0x55   :  { %v1101_v21 = vpop.eup %741  ;;  %761 = vpow2.f32 %v205_v50  ;;  %v238_v50 = vadd.f32 1.0, %v237_v58  ;;  %vm1132_vm4 = vcmp.lt.f32.partialorder %v231_v23, 0.0004427343  ;;  %v256_v45 = vadd.f32 1.0, %v255_v28 }
  0x56   :  { %v1106_v34 = vpop.eup %743  ;;  %763 = vlog2.f32 %v261_v17  ;;  %v273_v44 = vmul.f32 -0.5, %v1083_v47  ;;  %v1138_v10 = vmul.f32 %v1055_v13, %v229_v38  ;;  %v267_v11 = vand.u32 2147483647, %v1078_v43 }
  0x57   :  { %v1115_v42 = vpop.eup %745  ;;  %765 = vlog2.f32 %v270_v33  ;;  %v282_v31 = vmul.f32 -0.5, %v1087_v51  ;;  %v1143_v17 = vmul.f32 %v1059_v19, %v238_v50  ;;  %vm1145_vm5 = vcmp.lt.f32.partialorder %v240_v49, 0.0004427343 }
  0x58   :  { %v1124_v52 = vpop.eup %747  ;;  %767 = vlog2.f32 %v279_v41  ;;  %v265_v28 = vadd.f32 1.0, %v264_v48  ;;  %v1150_v26 = vmul.f32 %v1064_v25, %v247_v53  ;;  %vm1152_vm6 = vcmp.lt.f32.partialorder %v249_v54, 0.0004427343  ;;  %v70_v54 = vld [vmem:[#allocation7 + $0x38] sm:$0xff] }
  0x59   :  { %v750_v0 = vpop.eup %749  ;;  %769 = vlog2.f32 %v288_v60  ;;  %vm1156_vm7 = vcmp.lt.f32.partialorder %v258_v57, 0.0004427343  ;;  %v276_v19 = vand.u32 2147483647, %v1083_v47  ;;  %v1162_v41 = vmul.f32 %v1069_v30, %v256_v45 }
  0x5a   :  { %v752_v40 = vpop.eup %751  ;;  %v274_v48 = vadd.f32 1.0, %v273_v44  ;;  %v285_v50 = vand.u32 2147483647, %v1087_v51  ;;  %v291_v25 = vmul.f32 -0.5, %v1090_v55  ;;  %v209_v53 = vmul.f32 0.6931472, %v750_v0 }
  0x5b   :  { %v754_v27 = vpop.eup %753  ;;  %vm1166_vm8 = vcmp.lt.f32.partialorder %v267_v11, 0.0004427343  ;;  %v283_v57 = vadd.f32 1.0, %v282_v31  ;;  %v297_v20 = vadd.f32 1.0, %v1096_v63  ;;  %v218_v14 = vmul.f32 0.6931472, %v752_v40 }
  0x5c   :  { %v756_v33 = vpop.eup %755  ;;  %v227_v9 = vmul.f32 0.6931472, %v754_v27  ;;  %v1174_v30 = vmul.f32 %v1078_v43, %v265_v28  ;;  %v294_v44 = vand.u32 2147483647, %v1090_v55  ;;  %vm1181_vm11 = vcmp.lt.f32.partialorder %v276_v19, 0.0004427343 }
  0x5d   :  { %v758_v49 = vpop.eup %757  ;;  %v236_v0 = vmul.f32 0.6931472, %v756_v33  ;;  %v300_v45 = vmul.f32 -0.5, %v1096_v63  ;;  %v306_v27 = vadd.f32 1.0, %v1101_v21  ;;  %v1192_v11 = vmul.f32 %v1083_v47, %v274_v48 }
  0x5e   :  { %v760_v60 = vpop.eup %759  ;;  %v1187_v40 = vmul.f32 0.6931472, %v758_v49  ;;  %vm1194_vm12 = vcmp.lt.f32.partialorder %v285_v50, 0.0004427343  ;;  %v292_v33 = vadd.f32 1.0, %v291_v25  ;;  %v215_v62 = vsel %vm1117_vm2, %v1109_v36, %v209_v53 }
  0x5f   :  { %v1171_v15 = vpop.eup %761  ;;  %v1189_v43 = vmul.f32 0.6931472, %v760_v60  ;;  %v1204_v49 = vmul.f32 %v1087_v51, %v283_v57  ;;  %771 = vlog2.f32 %v297_v20  ;;  %v309_v47 = vmul.f32 -0.5, %v1101_v21 }
  0x60   :  { %v764_v19 = vpop.eup %763  ;;  %v224_v50 = vsel %vm1126_vm3, %v1112_v37, %v218_v14  ;;  %v233_v25 = vsel %vm1132_vm4, %v1138_v10, %v227_v9  ;;  %vm1213_vm14 = vcmp.lt.f32.partialorder %v294_v44, 0.0004427343  ;;  %v315_v36 = vadd.f32 1.0, %v1106_v34 }
  0x61   :  { %v766_v48 = vpop.eup %765  ;;  %v242_v20 = vsel %vm1145_vm5, %v1143_v17, %v236_v0  ;;  %v301_v46 = vadd.f32 1.0, %v300_v45  ;;  %v303_v14 = vand.u32 2147483647, %v1096_v63  ;;  %773 = vlog2.f32 %v306_v27 }
  0x62   :  { %v768_v51 = vpop.eup %767  ;;  %v251_v9 = vsel %vm1152_vm6, %v1150_v26, %v1187_v40  ;;  %v260_v7 = vsel %vm1156_vm7, %v1162_v41, %v1189_v43  ;;  %v1232_v58 = vmul.f32 0.6931472, %v764_v19  ;;  %v1235_v10 = vmul.f32 %v1090_v55, %v292_v33 }
  0x63   :  { %v770_v37 = vpop.eup %769  ;;  %v1239_v17 = vmul.f32 0.6931472, %v766_v48  ;;  %v310_v23 = vadd.f32 1.0, %v309_v47  ;;  %v312_v53 = vand.u32 2147483647, %v1101_v21  ;;  %v324_v26 = vadd.f32 1.0, %v1115_v42 }
  0x64   :  { %vm116_vm2 = vcmp.ne.f32.partialorder %v1006_v8, %v1006_v8  ;;  %775 = vlog2.f32 %v315_v36  ;;  %v318_v13 = vmul.f32 -0.5, %v1106_v34  ;;  %v351_v55 = vadd.f32 %v215_v62, %v95_v61  ;;  %v63_v47 = vld [vmem:[#allocation7] sm:$0xff]  ;;  %v64_v48 = vld [vmem:[#allocation7 + $0x8] sm:$0xff] }
  0x65   :  { %v1558_v38 = vmax.f32 %v996_v2, 0.0  ;;  %v1250_v57 = vmul.f32 0.6931472, %v768_v51  ;;  %v1252_v44 = vmul.f32 0.6931472, %v770_v37  ;;  %v1255_v0 = vmul.f32 %v1096_v63, %v301_v46 }
  0x66   :  { %vm1257_vm3 = vcmp.lt.f32.partialorder %v303_v14, 0.0004427343  ;;  %v327_v27 = vmul.f32 -0.5, %v1115_v42  ;;  %v269_v61 = vsel %vm1166_vm8, %v1174_v30, %v1232_v58  ;;  %v321_v62 = vand.u32 2147483647, %v1106_v34  ;;  %v65_v14 = vld [vmem:[#allocation7 + $0x10] sm:$0xff] }
  0x67   :  { %v352_v41 = vadd.f32 %v224_v50, %v1558_v38  ;;  %v333_v40 = vadd.f32 1.0, %v1124_v52  ;;  %v1561_v43 = vmax.f32 %v998_v3, 0.0  ;;  %vm117_vm4 = vcmp.ne.f32.partialorder %v1011_v12, %v1011_v12 }
  0x68   :  { %v278_v63 = vsel %vm1181_vm11, %v1192_v11, %v1239_v17  ;;  %v1277_v19 = vmul.f32 %v1101_v21, %v310_v23  ;;  %vm1279_vm5 = vcmp.lt.f32.partialorder %v312_v53, 0.0004427343  ;;  %777 = vlog2.f32 %v324_v26  ;;  %v66_v26 = vld [vmem:[#allocation7 + $0x18] sm:$0xff] }
  0x69   :  { %v353_v33 = vadd.f32 %v233_v25, %v1561_v43  ;;  %v342_v30 = vadd.f32 1.0, %v1171_v15  ;;  %v319_v50 = vadd.f32 1.0, %v318_v13  ;;  %v1564_v25 = vmax.f32 %v1000_v4, 0.0  ;;  %v772_v11 = vpop.eup %771  ;;  %v68_v43 = vld [vmem:[#allocation7 + $0x28] sm:$0xff] }
  0x6a   :  { %v367_v31 = vsel %vm111_vm9, %v994_v1, %v351_v55  ;;  %v368_v21 = vsel %vm112_vm10, %v996_v2, %v352_v41  ;;  %vm118_vm6 = vcmp.ne.f32.partialorder %v1014_v16, %v1014_v16  ;;  %v287_v51 = vsel %vm1194_vm12, %v1204_v49, %v1250_v57 }
  0x6b   :  { %v354_v36 = vadd.f32 %v242_v20, %v1564_v25  ;;  %v296_v20 = vsel %vm1213_vm14, %v1235_v10, %v1252_v44  ;;  %v328_v1 = vadd.f32 1.0, %v327_v27  ;;  %v330_v46 = vand.u32 2147483647, %v1115_v42  ;;  %v774_v60 = vpop.eup %773  ;;  %v67_v44 = vld [vmem:[#allocation7 + $0x20] sm:$0xff] }
  0x6c   :  { %vm1305_vm7 = vcmp.lt.f32.partialorder %v321_v62, 0.0004427343  ;;  %779 = vlog2.f32 %v333_v40  ;;  %v336_v37 = vmul.f32 -0.5, %v1124_v52  ;;  %v1567_v58 = vmax.f32 %v1002_v5, 0.0 }
  0x6d   :  { %v369_v49 = vsel %vm113_vm13, %v998_v3, %v353_v33  ;;  %vm119_vm8 = vcmp.ne.f32.partialorder %v1016_v18, %v1016_v18  ;;  %781 = vlog2.f32 %v342_v30  ;;  %v1568_v10 = vmax.f32 %v1006_v8, 0.0 }
  0x6e   :  { %v355_v28 = vadd.f32 %v251_v9, %v1567_v58  ;;  %v383_v23 = vadd.f32 %v367_v31, %v63_v47  ;;  %v384_v53 = vadd.f32 %v368_v21, %v64_v48  ;;  %v299_v13 = vmul.f32 0.6931472, %v772_v11  ;;  %v776_v57 = vpop.eup %775  ;;  %v69_v11 = vld [vmem:[#allocation7 + $0x30] sm:$0xff] }
  0x6f   :  { %v356_v17 = vadd.f32 %v260_v7, %v1568_v10  ;;  %v1321_v55 = vmul.f32 %v1106_v34, %v319_v50  ;;  %v339_v9 = vand.u32 2147483647, %v1124_v52  ;;  %v370_v3 = vsel %vm114_vm15, %v1000_v4, %v354_v36  ;;  %v73_v7 = vld [vmem:[#allocation7 + $0x50] sm:$0xff] }
  0x70   :  { %vm120_vm9 = vcmp.ne.f32.partialorder %v1019_v22, %v1019_v22  ;;  %v1331_v38 = vmul.f32 %v1115_v42, %v328_v1  ;;  %vm1333_vm10 = vcmp.lt.f32.partialorder %v330_v46, 0.0004427343  ;;  %v345_v34 = vmul.f32 -0.5, %v1171_v15 }
  0x71   :  { %v1338_v41 = vadd.f32 %v369_v49, %v65_v14  ;;  %v308_v27 = vmul.f32 0.6931472, %v774_v60  ;;  %v337_v62 = vadd.f32 1.0, %v336_v37  ;;  %v1571_v4 = vmax.f32 %v1011_v12, 0.0 }
  0x72   :  { %v371_v42 = vsel %vm115_vm1, %v1002_v5, %v355_v28  ;;  %vm121_vm11 = vcmp.ne.f32.partialorder %v1021_v24, %v1021_v24  ;;  %v372_v33 = vsel %vm116_vm2, %v1006_v8, %v356_v17  ;;  %v1352_v30 = vadd.f32 %v370_v3, %v66_v26  ;;  %v778_v31 = vpop.eup %777 }
  0x73   :  { %v357_v40 = vadd.f32 %v269_v61, %v1571_v4  ;;  %v485_v47 = vmul.f32 %v383_v23, %v383_v23  ;;  %v486_v48 = vmul.f32 %v384_v53, %v384_v53  ;;  %v305_v61 = vsel %vm1257_vm3, %v1255_v0, %v299_v13 }
  0x74   :  { %vm1357_vm12 = vcmp.lt.f32.partialorder %v339_v9, 0.0004427343  ;;  %v348_v5 = vand.u32 2147483647, %v1171_v15  ;;  %v1574_v25 = vmax.f32 %v1014_v16, 0.0  ;;  %vm122_vm13 = vcmp.ne.f32.partialorder %v1025_v29, %v1025_v29 }
  0x75   :  { %vm123_vm14 = vcmp.ne.f32.partialorder %v1028_v32, %v1028_v32  ;;  %v317_v8 = vmul.f32 0.6931472, %v776_v57  ;;  %v346_v21 = vadd.f32 1.0, %v345_v34  ;;  %v1368_v45 = vadd.f32 %v371_v42, %v67_v44 }
  0x76   :  { %v358_v36 = vadd.f32 %v278_v63, %v1574_v25  ;;  %v487_v0 = vmul.f32 %v1338_v41, %v1338_v41  ;;  %v314_v1 = vsel %vm1279_vm5, %v1277_v19, %v308_v27  ;;  %v1575_v63 = vmax.f32 %v1016_v18, 0.0  ;;  %v780_v60 = vpop.eup %779 }
  0x77   :  { %v373_v14 = vsel %vm117_vm4, %v1011_v12, %v357_v40  ;;  %v1381_v37 = vadd.f32 %v372_v33, %v68_v43  ;;  %v488_v58 = vmul.f32 %v1352_v30, %v1352_v30  ;;  %v501_v28 = vadd.f32 %v486_v48, %v485_v47  ;;  %v782_v26 = vpop.eup %781 }
  0x78   :  { %v359_v46 = vadd.f32 %v287_v51, %v1575_v63  ;;  %783 = vpow2.f32 %v1094_v59  ;;  %v679_v49 = vpack.c.bf16 %v384_v53, %v383_v23  ;;  %v326_v19 = vmul.f32 0.6931472, %v778_v31 }
  0x79   :  { %v338_v10 = vmul.f32 %v1124_v52, %v337_v62  ;;  %v1576_v51 = vmax.f32 %v1019_v22, 0.0  ;;  %v374_v12 = vsel %vm118_vm6, %v1014_v16, %v358_v36  ;;  %v323_v13 = vsel %vm1305_vm7, %v1321_v55, %v317_v8  ;;  %v71_v52 = vld [vmem:[#allocation7 + $0x40] sm:$0xff]  ;;  %v72_v62 = vld [vmem:[#allocation7 + $0x48] sm:$0xff] }
  0x7a   :  { %v1396_v59 = vadd.f32 %v373_v14, %v69_v11  ;;  %v489_v23 = vmul.f32 %v1368_v45, %v1368_v45  ;;  %v502_v53 = vadd.f32 %v501_v28, %v487_v0  ;;  %680 = vmatpush3.bf16.xpose.msra.mxu0 %v679_v49  ;;  %v1577_v9 = vmax.f32 %v1021_v24, 0.0 }
  0x7b   :  { %v360_v17 = vadd.f32 %v296_v20, %v1576_v51  ;;  %v347_v20 = vmul.f32 %v1171_v15, %v346_v21  ;;  %v1578_v16 = vmax.f32 %v1025_v29, 0.0  ;;  %v375_v2 = vsel %vm119_vm8, %v1016_v18, %v359_v46  ;;  %v74_v21 = vld [vmem:[#allocation7 + $0x58] sm:$0xff] }
  0x7c   :  { %v361_v3 = vadd.f32 %v305_v61, %v1577_v9  ;;  %v1579_v55 = vmov 0.0|0.0   ;;  %v335_v57 = vmul.f32 0.6931472, %v780_v60  ;;  %v1410_v44 = vadd.f32 %v374_v12, %v70_v54  ;;  %v76_v54 = vld [vmem:[#allocation7 + $0x68] sm:$0xff] }
  0x7d   :  { %v362_v34 = vadd.f32 %v314_v1, %v1578_v16  ;;  %681 = vmatprep.subr.bf16.mxu0 %v1579_v55  ;;  %v490_v27 = vmul.f32 %v1381_v37, %v1381_v37  ;;  %v503_v15 = vadd.f32 %v502_v53, %v488_v58  ;;  %v332_v4 = vsel %vm1333_vm10, %v1331_v38, %v326_v19  ;;  %v75_v1 = vld [vmem:[#allocation7 + $0x60] sm:$0xff] }
  0x7e   :  { %v344_v40 = vmul.f32 0.6931472, %v782_v26  ;;  %v1580_v42 = vmax.f32 %v1028_v32, 0.0  ;;  %v376_v18 = vsel %vm120_vm9, %v1019_v22, %v360_v17  ;;  %v1423_v33 = vadd.f32 %v375_v2, %v71_v52 }
  0x7f   :  { %v491_v47 = vmul.f32 %v1396_v59, %v1396_v59  ;;  %v504_v48 = vadd.f32 %v503_v15, %v489_v23  ;;  %v682_v61 = vpack.c.bf16 %v1352_v30, %v1338_v41  ;;  %v109_v38 = vmax.f32 %v1034_v39, 0.0  ;;  %v77_v23 = vld [vmem:[#allocation7 + $0x70] sm:$0xff] }
  0x80   :  { %v363_v43 = vadd.f32 %v323_v13, %v1580_v42  ;;  %v110_v25 = vmax.f32 %v1040_v56, 0.0  ;;  %vm1431_vm15 = vcmp.lt.f32.partialorder %v348_v5, 0.0004427343  ;;  %v377_v22 = vsel %vm121_vm11, %v1021_v24, %v361_v3 }
  0x81   :  { %v341_v31 = vsel %vm1357_vm12, %v338_v10, %v335_v57  ;;  %v1441_v8 = vadd.f32 %v376_v18, %v72_v62  ;;  %v492_v41 = vmul.f32 %v1410_v44, %v1410_v44  ;;  %v505_v30 = vadd.f32 %v504_v48, %v490_v27 }
  0x82   :  { %vm124_vm1 = vcmp.ne.f32.partialorder %v1031_v35, %v1031_v35  ;;  %v1583_v5 = vmax.f32 %v1031_v35, 0.0  ;;  %v378_v24 = vsel %vm122_vm13, %v1025_v29, %v362_v34  ;;  %v379_v50 = vsel %vm123_vm14, %v1028_v32, %v363_v43  ;;  %v784_v11 = vpop.eup %783  ;;  %683 = vmatpush3.bf16.xpose.msra.mxu0 %v682_v61 }
  0x83   :  { %v350_v63 = vsel %vm1431_vm15, %v347_v20, %v344_v40  ;;  %v1459_v46 = vadd.f32 %v377_v22, %v73_v7  ;;  %v493_v14 = vmul.f32 %v1423_v33, %v1423_v33  ;;  %v506_v58 = vadd.f32 %v505_v30, %v491_v47  ;;  %684 = vmatprep.subr.bf16.mxu0 %v1579_v55  ;;  %v533_v7 = vld [vmem:[%s1532_s3] sm:$0x1] }
  0x84   :  { %v364_v0 = vadd.f32 %v332_v4, %v1583_v5  ;;  %vm125_vm2 = vcmp.ne.f32.partialorder %v1034_v39, %v1034_v39  ;;  %v365_v29 = vadd.f32 %v341_v31, %v109_v38  ;;  %v542_v28 = vadd.f32 1.0, %v784_v11 }
  0x85   :  { %vm126_vm3 = vcmp.ne.f32.partialorder %v1040_v56, %v1040_v56  ;;  %v394_v32 = vadd.f32 %v378_v24, %v74_v21  ;;  %v494_v49 = vmul.f32 %v1441_v8, %v1441_v8  ;;  %v507_v60 = vadd.f32 %v506_v58, %v492_v41  ;;  %v407_v21 = vld [vmem:[#allocation4] sm:$0xff] }
  0x86   :  { %v366_v19 = vadd.f32 %v350_v63, %v110_v25  ;;  %v380_v10 = vsel %vm124_vm1, %v1031_v35, %v364_v0  ;;  %v395_v51 = vadd.f32 %v379_v50, %v75_v1  ;;  %785 = vlog2.f32 %v542_v28  ;;  %v78_v35 = vld [vmem:[#allocation7 + $0x78] sm:$0xff] }
  0x87   :  { %v495_v17 = vmul.f32 %v1459_v46, %v1459_v46  ;;  %v508_v12 = vadd.f32 %v507_v60, %v493_v14  ;;  %v545_v26 = vmul.f32 -0.5, %v784_v11  ;;  %v685_v13 = vpack.c.bf16 %v1381_v37, %v1368_v45 }
  0x88   :  { %v381_v53 = vsel %vm125_vm2, %v1034_v39, %v365_v29  ;;  %v396_v52 = vadd.f32 %v380_v10, %v76_v54  ;;  %v496_v20 = vmul.f32 %v394_v32, %v394_v32  ;;  %v382_v3 = vsel %vm126_vm3, %v1040_v56, %v366_v19 }
  0x89   :  { %v509_v9 = vadd.f32 %v508_v12, %v494_v49  ;;  %v397_v16 = vadd.f32 %v381_v53, %v77_v23  ;;  %v497_v34 = vmul.f32 %v395_v51, %v395_v51  ;;  %v546_v57 = vadd.f32 1.0, %v545_v26 }
  0x8a   :  { %686 = vmatpush3.bf16.xpose.msra.mxu0 %v685_v13  ;;  %v548_v45 = vand.u32 2147483647, %v784_v11  ;;  %v398_v37 = vadd.f32 %v382_v3, %v78_v35  ;;  %v498_v27 = vmul.f32 %v396_v52, %v396_v52  ;;  %v688_v40 = vpack.c.bf16 %v1410_v44, %v1396_v59 }
  0x8b   :  { %v510_v2 = vadd.f32 %v509_v9, %v495_v17  ;;  %687 = vmatprep.subr.bf16.mxu0 %v1579_v55  ;;  %v499_v15 = vmul.f32 %v397_v16, %v397_v16  ;;  %v547_v4 = vmul.f32 %v784_v11, %v546_v57  ;;  %v535_v56 = vmax.f32 %v1049_v6, 0.0 }
  0x8c   :  { %vm549_vm4 = vcmp.lt.f32.partialorder %v548_v45, 0.0004427343  ;;  %v500_v43 = vmul.f32 %v398_v37, %v398_v37  ;;  %vm536_vm5 = vcmp.ne.f32.partialorder %v1049_v6, %v1049_v6  ;;  %v691_v36 = vpack.c.bf16 %v1441_v8, %v1423_v33 }
  0x8d   :  { %v511_v39 = vadd.f32 %v510_v2, %v496_v20  ;;  %vm568_vm6 = vcmask 1040384   ;;  %v694_v41 = vpack.c.bf16 %v394_v32, %v1459_v46  ;;  %v697_v30 = vpack.c.bf16 %v396_v52, %v395_v51  ;;  %v484_v32 = vld [vmem:[#allocation3] sm:$0x1] }
  0x8e   :  { %v913_v33 = vmov 0   ;;  %v556_v26 = vlaneseq }
  0x8f   :  { %v512_v62 = vadd.f32 %v511_v39, %v497_v34  ;;  %717 = vset.pattern.permute.xlu1 %v913_v33  ;;  %718 = vset.pattern.permute.xlu0 %v913_v33 }
  0x90   :  { %v786_v42 = vpop.eup %785  ;;  %v557_v13 = vshrl.u32 %v556_v26, 7 }
  0x91   :  { %v513_v18 = vadd.f32 %v512_v62, %v498_v27  ;;  %v544_v47 = vmul.f32 0.6931472, %v786_v42 }
  0x92   :  { %689 = vmatpush3.bf16.xpose.msra.mxu0 %v688_v40  ;;  %v558_v23 = vsub.s32 0, %v557_v13 }
  0x93   :  { %v514_v48 = vadd.f32 %v513_v18, %v499_v15  ;;  %v550_v61 = vsel %vm549_vm4, %v547_v4, %v544_v47  ;;  %690 = vmatprep.subr.bf16.mxu0 %v1579_v55 }
  0x94   :  { %v551_v38 = vadd.f32 %v550_v61, %v535_v56 }
  0x95   :  { %v515_v59 = vadd.f32 %v514_v48, %v500_v43 }
  0x96   :  { %v552_v44 = vsel %vm536_vm5, %v1049_v6, %v551_v38  ;;  %v700_v6 = vpack.c.bf16 %v398_v37, %v397_v16 }
  0x97   :  { %516 = vadd.xlane.f32.xlu0 %v515_v59  ;;  %v553_v25 = vadd.f32 %v552_v44, %v533_v7 }
  0x99   :  { %v567_v22 = vmul.f32 %v553_v25, %v553_v25  ;;  %v559_v53 = vrot.slane %v553_v25, %v558_v23 }
  0x9a   :  { %692 = vmatpush3.bf16.xpose.msra.mxu0 %v691_v36 }
  0x9b   :  { %v569_v31 = vsel %vm568_vm6, %v567_v22, 0.0  ;;  %693 = vmatprep.subr.bf16.mxu0 %v1579_v55 }
  0x9c   :  { %570 = vadd.xlane.f32.xlu0 %v569_v31 }
  0xa2   :  { %695 = vmatpush3.bf16.xpose.msra.mxu0 %v694_v41 }
  0xa3   :  { %696 = vmatprep.subr.bf16.mxu0 %v1579_v55 }
  0xaa   :  { %698 = vmatpush3.bf16.xpose.msra.mxu0 %v697_v30 }
  0xab   :  { %699 = vmatprep.subr.bf16.mxu0 %v1579_v55 }
  0xb2   :  { %701 = vmatpush3.bf16.xpose.msra.mxu0 %v700_v6 }
  0xb9   :  { %676 = vmatmul.mubr.f32.vlgmr.msra.gmra.mrb[0].mxu0 %v407_v21 }
 0x124   :  { %v517_v8 = vpop.xlane.xlu0 %516 }
 0x125   :  { %v518_v5 = vrot.slane %v517_v8, 4 }
 0x127   :  { %v519_v0 = vadd.f32 %v518_v5, %v517_v8 }
 0x129   :  { %v520_v24 = vrot.slane %v519_v0, 2  ;;  %v571_v50 = vpop.xlane.xlu0 %570 }
 0x12a   :  { %v572_v11 = vrot.slane %v571_v50, 4 }
 0x12b   :  { %v521_v1 = vadd.f32 %v520_v24, %v519_v0 }
 0x12c   :  { %v573_v63 = vadd.f32 %v572_v11, %v571_v50 }
 0x12d   :  { %v522_v46 = vrot.slane %v521_v1, 1 }
 0x12e   :  { %v574_v14 = vrot.slane %v573_v63, 2 }
 0x12f   :  { %v523_v58 = vadd.f32 %v522_v46, %v521_v1 }
 0x130   :  { %v575_v29 = vadd.f32 %v574_v14, %v573_v63 }
 0x131   :  { %702 = vpush %v523_v58 }
 0x132   :  { %v576_v55 = vrot.slane %v575_v29, 1 }
 0x134   :  { %v577_v28 = vadd.f32 %v576_v55, %v575_v29 }
 0x136   :  { %704 = vpush %v577_v28 }
 0x162   :  { %s703_s3 = spop %702 }
 0x163   :  { %v525_v49 = vstv %s703_s3 }
 0x164   :  { %v526_v60 = vmul.f32 -0.5, %v525_v49 }
 0x166   :  { %v527_v54 = vadd.f32 %v526_v60, %v484_v32 }
 0x167   :  { %s705_s11 = spop %704 }
 0x168   :  { %529 = vst.msk [vmem:[#allocation3] sm:$0x1] %vm404_vm0, %v527_v54  ;;  %v579_v19 = vstv %s705_s11 }
 0x169   :  { %v580_v10 = vmul.f32 -0.5, %v579_v19 }
 0x16f   :  { %v566_v51 = vld [vmem:[#allocation3] sm:$0x1] }
 0x170   :  { %v581_v17 = vadd.f32 %v580_v10, %v566_v51 }
 0x172   :  { %583 = vst.msk [vmem:[#allocation3] sm:$0x1] %vm404_vm0, %v581_v17 }
 0x179   :  { %v625_v12 = vld [vmem:[#allocation3] ss:$0 sm:$0xff] }
 0x17a   :  { %591 = vperm.xlu1 %717, %v625_v12  }
 0x18c   :  { %v474_v52 = vpop.f32.mrb[0].mxu0 }
 0x18d   :  { %v561_v20 = vadd.f32 %v559_v53, %v474_v52  ;;  %v677_v9 = vpop.f32.mrb[1].mxu0 }
 0x18f   :  { %562 = vst [vmem:[#allocation10] sm:$0xff] %v561_v20 }
 0x190   :  { %864 = shalt.err (!%p861_p0)
}
 0x191   :  { %s865_s17 = scalar_lea.hbm %s1534_s5, 128 }
 0x192   :  { %p866_p1 = scmp.ne.s32.totalorder %s1534_s5, %s865_s17  ;;  %p869_p2 = scmp.lt.u32.totalorder %s865_s17, %s1534_s5 }
 0x194   :  { %p871_p3 = pnand %p869_p2, %p866_p1 }
 0x196   :  { %874 = shalt.err (!%p871_p3)
}
 0x197   :  { %604 = dma.vmem_to_hbm [thread:$0]  %s602_s13, 128, %s1534_s5, [#allocation6]  }
 0x198   :  { %s915_s23 = smov [#allocation11]  }
 0x199   :  { %s611_s24 = sshll.u32 %s915_s23, 4  ;;  %s612_s24 = int_to_ptr.vmem [resolvable:$true] %s611_s24 }
 0x19a   :  { %s875_s25 = scalar_lea.vmem %s612_s24, 128  ;;  %p880_p5 = scmp.lt.s32.totalorder %s612_s24, %s612_s24 }
 0x19b   :  { %p876_p4 = scmp.ne.s32.totalorder %s612_s24, %s875_s25  ;;  %p881_p6 = scmp.lt.s32.totalorder %s875_s25, %s875_s25 }
 0x19d   :  { %p882_p7 = por %p881_p6, %p880_p5 }
 0x19f   :  { %p883_p8 = pnand %p882_p7, %p876_p4 }
 0x1f9   :  { %v592_v35 = vpop.permute.xlu1 %591 }
 0x1fa   :  { %594 = vst [vmem:[#allocation11] sm:$0xff] %v592_v35 }
 0x1fb   :  { %886 = shalt.err (!%p883_p8)
}
 0x1fc   :  { %s887_s28 = scalar_lea.hbm %s1535_s6, 128 }
 0x1fd   :  { %p888_p9 = scmp.ne.s32.totalorder %s1535_s6, %s887_s28  ;;  %p891_p10 = scmp.lt.u32.totalorder %s887_s28, %s1535_s6 }
 0x1ff   :  { %p893_p11 = pnand %p891_p10, %p888_p9 }
 0x201   :  { %896 = shalt.err (!%p893_p11)
}
 0x202   :  { %614 = dma.vmem_to_hbm [thread:$0]  %s612_s24, 128, %s1535_s6, [#allocation12]  }
 0x203   :  { %901 = dma.done.wait [#allocation6], 128  }
 0x204   :  { %902 = vsyncadd [#allocation6], 4294967168 }
 0x205   :  { %903 = dma.done.wait [#allocation12], 128  }
 0x206   :  { %904 = vsyncadd [#allocation12], 4294967168 }
 0x207   :  { %621 = vsyncpa [#allocation5], 1 }
 0x208   :  { %622 = vsyncpa [#allocation8], 1 }
 0x209   :  { %623 = vsyncpa [#allocation6], 1 }
 0x20a   :  { %624 = vsyncpa [#allocation12], 1 }

</bundles_post_ra>
